<compile_context>
chip_gen: v7x
topology: tpu7x:2x2x1
jax: 0.10.0
libtpu: 0.0.40
codegen_flags: <defaults>
</compile_context>

<pallas_src>
import functools

import jax
import jax.numpy as jnp
from jax.experimental import pallas as pl
from jax.experimental.pallas import tpu as pltpu


def _round_up(x, m):
    return ((x + m - 1) // m) * m


def _vmem_limit_bytes(*tile_bytes, headroom=2 << 20, cap=64 << 20):
    # 2x for double-buffered pipelining of every tile, plus headroom.
    need = 2 * int(sum(tile_bytes)) + headroom
    return int(min(max(need, 8 << 20), cap))


# ---------------------------------------------------------------------------
# Kernel 1: dense(H->E) + GELU + LayerNorm(E), one M-tile per grid step.
# ---------------------------------------------------------------------------
def transform_kernel(x_ref, w_ref, b_ref, gamma_ref, beta_ref, o_ref, *, eps):
    # x_ref: (tm, H)   w_ref: (H, E)   b/gamma/beta: (1, E) f32   o_ref: (tm, E)
    h = jnp.dot(x_ref[...], w_ref[...], preferred_element_type=jnp.float32)
    h = h + b_ref[...]

    # GELU (tanh approximation), math in f32.
    # TODO(synk): PyTorch ACT2FN["gelu"] is the exact erf GELU; tanh approx is
    # used for guaranteed Mosaic lowering (max abs diff ~1e-3).
    c = 0.7978845608028654  # sqrt(2/pi), Python float -> jaxpr literal
    h = 0.5 * h * (1.0 + jnp.tanh(c * (h + 0.044715 * h * h * h)))

    # LayerNorm over the embedding axis (f32).
    mean = jnp.mean(h, axis=-1, keepdims=True)
    centered = h - mean
    var = jnp.mean(centered * centered, axis=-1, keepdims=True)
    normed = centered * jax.lax.rsqrt(var + eps)
    o_ref[...] = (normed * gamma_ref[...] + beta_ref[...]).astype(o_ref.dtype)


# ---------------------------------------------------------------------------
# Kernel 2: decoder matmul [M,E] @ [E,V] + bias, tiled over (V, M).
# ---------------------------------------------------------------------------
def decoder_kernel(y_ref, w_ref, b_ref, o_ref):
    # y_ref: (tm, E)   w_ref: (E, tn)   b_ref: (1, tn) f32   o_ref: (tm, tn)
    acc = jnp.dot(y_ref[...], w_ref[...], preferred_element_type=jnp.float32)
    o_ref[...] = (acc + b_ref[...]).astype(o_ref.dtype)


# ---------------------------------------------------------------------------
# Wrapper
# ---------------------------------------------------------------------------
def deberta_v2_mlm_head(
    hidden_states,      # [B, S, H]
    dense_w,            # [E, H]  (PyTorch out,in)
    dense_b,            # [E]
    ln_gamma,           # [E]
    ln_beta,            # [E]
    decoder_w,          # [V, E]  (PyTorch out,in)
    decoder_b,          # [V]
    *,
    layer_norm_eps=1e-7,
    tm=256,             # M tile (rows); 256 fits v7x's 64 MiB VMEM comfortably
    tn=512,             # V tile (vocab cols); multiple of 256 for v6e/v7x MXU
    compute_dtype=None, # e.g. jnp.bfloat16 for the matmul operands
):
    B, S, H = hidden_states.shape
    E = dense_w.shape[0]
    V = decoder_w.shape[0]
    M = B * S
    out_dtype = hidden_states.dtype
    if compute_dtype is None:
        compute_dtype = hidden_states.dtype
    itemsize = jnp.dtype(compute_dtype).itemsize
    out_itemsize = jnp.dtype(out_dtype).itemsize

    # Clamp tiles for small problems; keep (8, 128) alignment.
    tm = _round_up(max(8, min(int(tm), _round_up(M, 8))), 8)
    tn = _round_up(max(128, min(int(tn), _round_up(V, 128))), 128)
    Mp = _round_up(M, tm)
    Vp = _round_up(V, tn)
    nm = Mp // tm
    nv = Vp // tn

    # --- transform: dense + gelu + layernorm -------------------------------
    x = hidden_states.reshape(M, H).astype(compute_dtype)
    if Mp != M:
        x = jnp.pad(x, ((0, Mp - M), (0, 0)))

    w1 = dense_w.T.astype(compute_dtype)           # (H, E)
    b1 = dense_b.reshape(1, E).astype(jnp.float32)
    g1 = ln_gamma.reshape(1, E).astype(jnp.float32)
    be1 = ln_beta.reshape(1, E).astype(jnp.float32)

    # TODO(synk): w1's index_map is constant; Pallas still reserves 2 buffers.
    # pl.Buffered(1) / a one-shot scratch load would reclaim ~H*E bytes of VMEM.
    transform_vmem = _vmem_limit_bytes(
        tm * H * itemsize, H * E * itemsize, tm * E * itemsize, 3 * E * 4)

    transformed = pl.pallas_call(
        functools.partial(transform_kernel, eps=float(layer_norm_eps)),
        out_shape=jax.ShapeDtypeStruct((Mp, E), compute_dtype),
        grid_spec=pltpu.PrefetchScalarGridSpec(
            num_scalar_prefetch=0,
            grid=(nm,),
            in_specs=[
                pl.BlockSpec((tm, H), lambda i: (i, 0)),
                pl.BlockSpec((H, E), lambda i: (0, 0)),
                pl.BlockSpec((1, E), lambda i: (0, 0)),
                pl.BlockSpec((1, E), lambda i: (0, 0)),
                pl.BlockSpec((1, E), lambda i: (0, 0)),
            ],
            out_specs=pl.BlockSpec((tm, E), lambda i: (i, 0)),
        ),
        compiler_params=pltpu.CompilerParams(
            dimension_semantics=("parallel",),
            vmem_limit_bytes=transform_vmem),
        cost_estimate=pl.CostEstimate(
            flops=2 * Mp * H * E,
            transcendentals=Mp * E,
            bytes_accessed=(Mp * H + H * E + Mp * E) * itemsize),
    )(x, w1, b1, g1, be1)

    # --- decoder: matmul + bias --------------------------------------------
    w2 = decoder_w.T.astype(compute_dtype)         # (E, V)
    b2 = decoder_b.reshape(1, V).astype(jnp.float32)
    if Vp != V:
        w2 = jnp.pad(w2, ((0, 0), (0, Vp - V)))
        b2 = jnp.pad(b2, ((0, 0), (0, Vp - V)))

    decoder_vmem = _vmem_limit_bytes(
        tm * E * itemsize, E * tn * itemsize, tm * tn * out_itemsize, tn * 4)

    # Grid ordered (V-tiles outer, M-tiles inner): the huge decoder weight is
    # streamed from HBM exactly once per call; the small activation tiles are
    # the ones re-read. Leading axis also has the larger trip count, so it
    # shards across the 2 TensorCores on v7x.
    # TODO(synk): consider pipeline_mode=pl.Buffered(3) on the w2 spec if the
    # per-tile DMA is ever exposed at very small tm.
    logits = pl.pallas_call(
        decoder_kernel,
        out_shape=jax.ShapeDtypeStruct((Mp, Vp), out_dtype),
        grid_spec=pltpu.PrefetchScalarGridSpec(
            num_scalar_prefetch=0,
            grid=(nv, nm),
            in_specs=[
                pl.BlockSpec((tm, E), lambda v, m: (m, 0)),
                pl.BlockSpec((E, tn), lambda v, m: (0, v)),
                pl.BlockSpec((1, tn), lambda v, m: (0, v)),
            ],
            out_specs=pl.BlockSpec((tm, tn), lambda v, m: (m, v)),
        ),
        compiler_params=pltpu.CompilerParams(
            dimension_semantics=("parallel", "parallel"),
            vmem_limit_bytes=decoder_vmem),
        cost_estimate=pl.CostEstimate(
            flops=2 * Mp * E * Vp,
            transcendentals=0,
            bytes_accessed=(Mp * E + E * Vp) * itemsize + Mp * Vp * out_itemsize),
    )(transformed, w2, b2)

    return logits[:M, :V].reshape(B, S, V)


# ---------------------------------------------------------------------------
# Pure-JAX reference for verification (same tanh-GELU as the kernel)
# ---------------------------------------------------------------------------
def reference(hidden_states, dense_w, dense_b, ln_gamma, ln_beta,
              decoder_w, decoder_b, eps=1e-7):
    h = hidden_states @ dense_w.T + dense_b
    c = 0.7978845608028654
    h = 0.5 * h * (1.0 + jnp.tanh(c * (h + 0.044715 * h ** 3)))
    mean = jnp.mean(h, axis=-1, keepdims=True)
    var = jnp.mean((h - mean) ** 2, axis=-1, keepdims=True)
    h = (h - mean) / jnp.sqrt(var + eps) * ln_gamma + ln_beta
    return h @ decoder_w.T + decoder_b


if __name__ == "__main__":
    # Small synthetic config. S=7 and V=200 deliberately exercise the
    # pad-to-tile / slice-back path (M and V not multiples of the tiles).
    B, S, H, E, V = 2, 7, 32, 32, 200

    key = jax.random.PRNGKey(0)
    k = jax.random.split(key, 6)
    hidden_states = jax.random.normal(k[0], (B, S, H), dtype=jnp.float32)
    dense_w = jax.random.normal(k[1], (E, H), dtype=jnp.float32) * 0.05
    dense_b = jax.random.normal(k[2], (E,), dtype=jnp.float32) * 0.05
    ln_gamma = 1.0 + 0.1 * jax.random.normal(k[3], (E,), dtype=jnp.float32)
    ln_beta = 0.1 * jax.random.normal(k[4], (E,), dtype=jnp.float32)
    decoder_w = jax.random.normal(k[5], (V, E), dtype=jnp.float32) * 0.05
    decoder_b = jnp.zeros((V,), dtype=jnp.float32)   # matches Parameter(zeros(V))

    ref = reference(hidden_states, dense_w, dense_b, ln_gamma, ln_beta,
                    decoder_w, decoder_b, eps=1e-7)

    # f32 compute path: tight parity check.
    out = deberta_v2_mlm_head(
        hidden_states, dense_w, dense_b, ln_gamma, ln_beta,
        decoder_w, decoder_b, layer_norm_eps=1e-7,
        compute_dtype=jnp.float32)
    out = jax.block_until_ready(out)
    assert out.shape == (B, S, V), out.shape
    assert jnp.allclose(out, ref, atol=1e-4, rtol=1e-4), float(
        jnp.max(jnp.abs(out - ref)))

    # bf16 compute path (production config): looser tolerance.
    out_bf16 = deberta_v2_mlm_head(
        hidden_states, dense_w, dense_b, ln_gamma, ln_beta,
        decoder_w, decoder_b, layer_norm_eps=1e-7,
        compute_dtype=jnp.bfloat16)
    out_bf16 = jax.block_until_ready(out_bf16)
    assert out_bf16.shape == (B, S, V), out_bf16.shape
    err = float(jnp.max(jnp.abs(out_bf16.astype(jnp.float32) - ref)))
    assert err < 5e-2, err

    print("KERNEL_OK")
</pallas_src>

<mosaic_0001>
module attributes {stable_mosaic.version = 11 : i64} {
  func.func @transform_kernel(%arg0: i32, %arg1: memref<16x32xf32, #tpu.memory_space<vmem>>, %arg2: memref<32x32xf32, #tpu.memory_space<vmem>>, %arg3: memref<1x32xf32, #tpu.memory_space<vmem>>, %arg4: memref<1x32xf32, #tpu.memory_space<vmem>>, %arg5: memref<1x32xf32, #tpu.memory_space<vmem>>, %arg6: memref<16x32xf32, #tpu.memory_space<vmem>>) attributes {dimension_semantics = [#tpu.dimension_semantics<parallel>], iteration_bounds = array<i64: 1>, scalar_prefetch = 0 : i64, scratch_operands = 0 : i64, tpu.core_type = #tpu.core_type<tc>, window_params = [{transform_indices = @transform_0, window_bounds = array<i64: 16, 32>}, {pipeline_mode = #tpu.pipeline_mode<synchronous>, transform_indices = @transform_1, window_bounds = array<i64: 32, 32>}, {pipeline_mode = #tpu.pipeline_mode<synchronous>, transform_indices = @transform_2, window_bounds = array<i64: 1, 32>}, {pipeline_mode = #tpu.pipeline_mode<synchronous>, transform_indices = @transform_3, window_bounds = array<i64: 1, 32>}, {pipeline_mode = #tpu.pipeline_mode<synchronous>, transform_indices = @transform_4, window_bounds = array<i64: 1, 32>}, {transform_indices = @transform_5, window_bounds = array<i64: 16, 32>}]} {
    %c0 = arith.constant 0 : index
    %c0_0 = arith.constant 0 : index
    %0 = vector.load %arg1[%c0, %c0_0] : memref<16x32xf32, #tpu.memory_space<vmem>>, vector<16x32xf32>
    %c0_1 = arith.constant 0 : index
    %c0_2 = arith.constant 0 : index
    %1 = vector.load %arg2[%c0_1, %c0_2] : memref<32x32xf32, #tpu.memory_space<vmem>>, vector<32x32xf32>
    %cst = arith.constant dense<0.000000e+00> : vector<16x32xf32>
    %2 = tpu.matmul %0, %1, %cst {dimension_numbers = #tpu.dot_dimension_numbers<[1], [0], [0], [1], [0, 0, 1, 1], [], []>} : vector<16x32xf32>, vector<32x32xf32>, vector<16x32xf32> -> vector<16x32xf32>
    %c0_3 = arith.constant 0 : index
    %c0_4 = arith.constant 0 : index
    %3 = vector.load %arg3[%c0_3, %c0_4] : memref<1x32xf32, #tpu.memory_space<vmem>>, vector<1x32xf32>
    %4 = vector.broadcast %3 : vector<1x32xf32> to vector<16x32xf32>
    %5 = arith.addf %2, %4 : vector<16x32xf32>
    %cst_5 = arith.constant 5.000000e-01 : f32
    %6 = vector.broadcast %cst_5 : f32 to vector<16x32xf32>
    %7 = arith.mulf %6, %5 : vector<16x32xf32>
    %cst_6 = arith.constant 4.471500e-02 : f32
    %8 = vector.broadcast %cst_6 : f32 to vector<16x32xf32>
    %9 = arith.mulf %8, %5 : vector<16x32xf32>
    %10 = arith.mulf %9, %5 : vector<16x32xf32>
    %11 = arith.mulf %10, %5 : vector<16x32xf32>
    %12 = arith.addf %5, %11 : vector<16x32xf32>
    %cst_7 = arith.constant 0.797884583 : f32
    %13 = vector.broadcast %cst_7 : f32 to vector<16x32xf32>
    %14 = arith.mulf %13, %12 : vector<16x32xf32>
    %15 = math.tanh %14 : vector<16x32xf32>
    %cst_8 = arith.constant 1.000000e+00 : f32
    %16 = vector.broadcast %cst_8 : f32 to vector<16x32xf32>
    %17 = arith.addf %16, %15 : vector<16x32xf32>
    %18 = arith.mulf %7, %17 : vector<16x32xf32>
    %cst_9 = arith.constant dense<0.000000e+00> : vector<16xf32>
    %19 = vector.multi_reduction <add>, %18, %cst_9 [1] : vector<16x32xf32> to vector<16xf32>
    %20 = vector.shape_cast %19 : vector<16xf32> to vector<16x1xf32>
    %cst_10 = arith.constant 3.200000e+01 : f32
    %21 = vector.broadcast %cst_10 : f32 to vector<16x1xf32>
    %22 = arith.divf %20, %21 : vector<16x1xf32>
    %23 = vector.broadcast %22 : vector<16x1xf32> to vector<16x32xf32>
    %24 = arith.subf %18, %23 : vector<16x32xf32>
    %25 = arith.mulf %24, %24 : vector<16x32xf32>
    %cst_11 = arith.constant dense<0.000000e+00> : vector<16xf32>
    %26 = vector.multi_reduction <add>, %25, %cst_11 [1] : vector<16x32xf32> to vector<16xf32>
    %27 = vector.shape_cast %26 : vector<16xf32> to vector<16x1xf32>
    %cst_12 = arith.constant 3.200000e+01 : f32
    %28 = vector.broadcast %cst_12 : f32 to vector<16x1xf32>
    %29 = arith.divf %27, %28 : vector<16x1xf32>
    %cst_13 = arith.constant 1.000000e-07 : f32
    %30 = vector.broadcast %cst_13 : f32 to vector<16x1xf32>
    %31 = arith.addf %29, %30 : vector<16x1xf32>
    %32 = math.rsqrt %31 : vector<16x1xf32>
    %33 = vector.broadcast %32 : vector<16x1xf32> to vector<16x32xf32>
    %34 = arith.mulf %24, %33 : vector<16x32xf32>
    %c0_14 = arith.constant 0 : index
    %c0_15 = arith.constant 0 : index
    %35 = vector.load %arg4[%c0_14, %c0_15] : memref<1x32xf32, #tpu.memory_space<vmem>>, vector<1x32xf32>
    %36 = vector.broadcast %35 : vector<1x32xf32> to vector<16x32xf32>
    %37 = arith.mulf %34, %36 : vector<16x32xf32>
    %c0_16 = arith.constant 0 : index
    %c0_17 = arith.constant 0 : index
    %38 = vector.load %arg5[%c0_16, %c0_17] : memref<1x32xf32, #tpu.memory_space<vmem>>, vector<1x32xf32>
    %39 = vector.broadcast %38 : vector<1x32xf32> to vector<16x32xf32>
    %40 = arith.addf %37, %39 : vector<16x32xf32>
    %c0_18 = arith.constant 0 : index
    %c0_19 = arith.constant 0 : index
    %41 = vector.load %arg6[%c0_18, %c0_19] : memref<16x32xf32, #tpu.memory_space<vmem>>, vector<16x32xf32>
    tpu.vector_store %arg6[%c0_18, %c0_19], %40 {strides = array<i32>} : memref<16x32xf32, #tpu.memory_space<vmem>>, vector<16x32xf32>,
    return
  }
  func.func @transform_0(%arg0: i32) -> (i32, i32) {
    %c0_i32 = arith.constant 0 : i32
    %c0_i32_0 = arith.constant 0 : i32
    return %arg0, %c0_i32 : i32, i32
  }
  func.func @transform_1(%arg0: i32) -> (i32, i32) {
    %c0_i32 = arith.constant 0 : i32
    %c0_i32_0 = arith.constant 0 : i32
    %c0_i32_1 = arith.constant 0 : i32
    return %c0_i32, %c0_i32_0 : i32, i32
  }
  func.func @transform_2(%arg0: i32) -> (i32, i32) {
    %c0_i32 = arith.constant 0 : i32
    %c0_i32_0 = arith.constant 0 : i32
    %c0_i32_1 = arith.constant 0 : i32
    return %c0_i32, %c0_i32_0 : i32, i32
  }
  func.func @transform_3(%arg0: i32) -> (i32, i32) {
    %c0_i32 = arith.constant 0 : i32
    %c0_i32_0 = arith.constant 0 : i32
    %c0_i32_1 = arith.constant 0 : i32
    return %c0_i32, %c0_i32_0 : i32, i32
  }
  func.func @transform_4(%arg0: i32) -> (i32, i32) {
    %c0_i32 = arith.constant 0 : i32
    %c0_i32_0 = arith.constant 0 : i32
    %c0_i32_1 = arith.constant 0 : i32
    return %c0_i32, %c0_i32_0 : i32, i32
  }
  func.func @transform_5(%arg0: i32) -> (i32, i32) {
    %c0_i32 = arith.constant 0 : i32
    %c0_i32_0 = arith.constant 0 : i32
    return %arg0, %c0_i32 : i32, i32
  }
}

</mosaic_0001>

<bundles_post_ra>
// kernel: tpu_custom_call.1
= control target key start
LH: loop header
LB: loop body
LE: loop exit
PB: predicated region body
PF: predicated region fallthrough
CT: control target
= control target key end

     0   :  { %10 = vsyncpa [#allocation3], 0  ;;  %s439_s0 = inlined_call_operand.hbm [shape: f32[16,32], index: 0, kind: input, shape index: {}]   ;;  %s440_s1 = inlined_call_operand.hbm [shape: f32[32,32], index: 1, kind: input, shape index: {}]   ;;  %s441_s2 = inlined_call_operand.vmem [shape: f32[1,32], index: 2, kind: input, shape index: {}]   ;;  %s442_s3 = inlined_call_operand.vmem [shape: f32[1,32], index: 3, kind: input, shape index: {}]   ;;  %s443_s4 = inlined_call_operand.vmem [shape: f32[1,32], index: 4, kind: input, shape index: {}]   ;;  %s444_s5 = inlined_call_operand.hbm [shape: f32[16,32], index: 5, kind: output, shape index: {}]  }
   0x1   :  { %11 = vsyncpa [#allocation6], 0 }
   0x2   :  { %12 = vsyncpa [#allocation4], 0  ;;  %s342_s18 = smov [#allocation2]   ;;  %s270_s22 = scalar_lea.hbm %s439_s0, 256 }
   0x3   :  { %s18_s19 = sshll.u32 %s342_s18, 4  ;;  %p271_p0 = scmp.ne.s32.totalorder %s439_s0, %s270_s22  ;;  %s19_s19 = int_to_ptr.vmem [resolvable:$true] %s18_s19 }
   0x4   :  { %p274_p1 = scmp.lt.u32.totalorder %s270_s22, %s439_s0 }
   0x6   :  { %p276_p2 = pnand %p274_p1, %p271_p0 }
   0x8   :  { %279 = shalt.err (!%p276_p2)
}
   0x9   :  { %s280_s27 = scalar_lea.vmem %s19_s19, 256  ;;  %p285_p4 = scmp.lt.s32.totalorder %s19_s19, %s19_s19 }
   0xa   :  { %p281_p3 = scmp.ne.s32.totalorder %s19_s19, %s280_s27  ;;  %p286_p5 = scmp.lt.s32.totalorder %s280_s27, %s280_s27 }
   0xc   :  { %p287_p6 = por %p286_p5, %p285_p4 }
   0xe   :  { %p288_p7 = pnand %p287_p6, %p281_p3 }
  0x10   :  { %291 = shalt.err (!%p288_p7)
}
  0x11   :  { %s343_s28 = smov 128   ;;  %s344_s29 = smov 8  }
  0x12   :  { %24 = dma.hbm_to_vmem [thread:$0]  %s439_s0, 256, %s19_s19, [#allocation3], %s343_s28, %s343_s28, %s344_s29  }
  0x13   :  { %s345_s7 = smov [#allocation5]   ;;  %s292_s11 = scalar_lea.hbm %s440_s1, 512 }
  0x14   :  { %s30_s8 = sshll.u32 %s345_s7, 4  ;;  %p293_p8 = scmp.ne.s32.totalorder %s440_s1, %s292_s11  ;;  %s31_s8 = int_to_ptr.vmem [resolvable:$true] %s30_s8 }
  0x15   :  { %p296_p9 = scmp.lt.u32.totalorder %s292_s11, %s440_s1 }
  0x17   :  { %p298_p10 = pnand %p296_p9, %p293_p8 }
  0x19   :  { %301 = shalt.err (!%p298_p10)
}
  0x1a   :  { %s302_s16 = scalar_lea.vmem %s31_s8, 512  ;;  %p307_p12 = scmp.lt.s32.totalorder %s31_s8, %s31_s8 }
  0x1b   :  { %p303_p11 = scmp.ne.s32.totalorder %s31_s8, %s302_s16  ;;  %p308_p13 = scmp.lt.s32.totalorder %s302_s16, %s302_s16 }
  0x1d   :  { %p309_p0 = por %p308_p13, %p307_p12 }
  0x1f   :  { %p310_p1 = pnand %p309_p0, %p303_p11 }
  0x21   :  { %313 = shalt.err (!%p310_p1)
}
  0x22   :  { %36 = dma.hbm_to_vmem [thread:$0]  %s440_s1, 512, %s31_s8, [#allocation6], %s343_s28, %s343_s28, %s344_s29  }
  0x23   :  { %336 = dma.done.wait [#allocation3], 256  }
  0x24   :  { %337 = vsyncadd [#allocation3], 4294967040 }
  0x25   :  { %338 = dma.done.wait [#allocation6], 512  }
  0x26   :  { %339 = vsyncadd [#allocation6], 4294966784  ;;  %vm62_vm0 = vcmask 261120   ;;  %v51_v0 = vld [vmem:[#allocation5] sm:$0xff]  ;;  %v52_v1 = vld [vmem:[#allocation5 + $0x8] sm:$0xff]  ;;  %s346_s22 = smov [#allocation7]  }
  0x27   :  { %v53_v2 = vld [vmem:[#allocation5 + $0x10] sm:$0xff]  ;;  %v249_v3 = vpack.c.bf16 %v52_v1, %v51_v0  ;;  %v54_v4 = vld [vmem:[#allocation5 + $0x18] sm:$0xff]  ;;  %s214_s23 = sshll.u32 %s346_s22, 4  ;;  %s215_s23 = int_to_ptr.vmem [resolvable:$true] %s214_s23 }
  0x28   :  { %v49_v5 = vld [vmem:[#allocation2] sm:$0xff]  ;;  %v253_v6 = vpack.c.bf16 %v54_v4, %v53_v2  ;;  %v50_v7 = vld [vmem:[#allocation2 + $0x8] sm:$0xff]  ;;  %s314_s24 = scalar_lea.vmem %s215_s23, 256  ;;  %p319_p3 = scmp.lt.s32.totalorder %s215_s23, %s215_s23 }
  0x29   :  { %246 = vmatprep.mubr.msk.f32.mxu0 %vm62_vm0, %v49_v5  ;;  %250 = vmatprep.subr.bf16.mxu0 %v249_v3  ;;  %v227_v8 = vld [vmem:[%s441_s2] ss:$0 sm:$0xff]  ;;  %p315_p2 = scmp.ne.s32.totalorder %s215_s23, %s314_s24  ;;  %p320_p4 = scmp.lt.s32.totalorder %s314_s24, %s314_s24 }
  0x2a   :  { %252 = vmatpush3.bf16.msra.mxu0 %v249_v3  ;;  %v230_v50 = vld [vmem:[%s442_s3] ss:$0 sm:$0xff] }
  0x2b   :  { %254 = vmatprep.subr.bf16.mxu0 %v253_v6  ;;  %v231_v52 = vld [vmem:[%s443_s4] ss:$0 sm:$0xff]  ;;  %p321_p5 = por %p320_p4, %p319_p3 }
  0x2d   :  { %p322_p6 = pnand %p321_p5, %p315_p2 }
  0x2e   :  { %256 = vmatpush3.bf16.msra.mxu0 %v253_v6 }
  0x31   :  { %247 = vmatmul.mubr.msk.f32.vlgmr.msra.gmra.mrb[0].mxu0 %vm62_vm0, %v50_v7 }
 0x104   :  { %v248_v9 = vpop.f32.mrb[0].mxu0 }
 0x105   :  { %v141_v10 = vadd.f32 %v248_v9, %v227_v8  ;;  %v135_v11 = vpop.f32.mrb[1].mxu0 }
 0x106   :  { %v136_v12 = vadd.f32 %v227_v8, %v135_v11 }
 0x107   :  { %v147_v13 = vmul.f32 0.044715, %v141_v10  ;;  %v145_v29 = vmul.f32 0.5, %v141_v10 }
 0x108   :  { %v146_v14 = vmul.f32 0.044715, %v136_v12  ;;  %v144_v25 = vmul.f32 0.5, %v136_v12 }
 0x109   :  { %v149_v15 = vmul.f32 %v147_v13, %v141_v10 }
 0x10a   :  { %v148_v16 = vmul.f32 %v146_v14, %v136_v12 }
 0x10b   :  { %v151_v17 = vmul.f32 %v149_v15, %v141_v10 }
 0x10c   :  { %v150_v18 = vmul.f32 %v148_v16, %v136_v12 }
 0x10d   :  { %v153_v19 = vadd.f32 %v151_v17, %v141_v10 }
 0x10e   :  { %v152_v20 = vadd.f32 %v150_v18, %v136_v12 }
 0x10f   :  { %v155_v21 = vmul.f32 0.7978846, %v153_v19 }
 0x110   :  { %v154_v22 = vmul.f32 0.7978846, %v152_v20 }
 0x111   :  { %262 = vtanh.f32 %v155_v21 }
 0x112   :  { %264 = vtanh.f32 %v154_v22 }
 0x11b   :  { %v263_v23 = vpop.eup %262 }
 0x11c   :  { %v265_v24 = vpop.eup %264  ;;  %v159_v27 = vadd.f32 1.0, %v263_v23 }
 0x11d   :  { %v158_v26 = vadd.f32 1.0, %v265_v24 }
 0x11e   :  { %v161_v31 = vmul.f32 %v159_v27, %v145_v29 }
 0x11f   :  { %v160_v28 = vmul.f32 %v158_v26, %v144_v25 }
 0x120   :  { %v165_v32 = vsel %vm62_vm0, %v161_v31, 0.0 }
 0x121   :  { %v162_v30 = vsel %vm62_vm0, %v160_v28, 0.0 }
 0x122   :  { %163 = vadd.xlane.f32.xlu0 %v162_v30 }
 0x126   :  { %166 = vadd.xlane.f32.xlu0 %v165_v32 }
 0x1af   :  { %v164_v33 = vpop.xlane.xlu0 %163 }
 0x1b0   :  { %v169_v34 = vmul.f32 0.03125, %v164_v33 }
 0x1b2   :  { %v171_v35 = vsub.f32 %v160_v28, %v169_v34 }
 0x1b3   :  { %v167_v36 = vpop.xlane.xlu0 %166 }
 0x1b4   :  { %v170_v37 = vmul.f32 0.03125, %v167_v36  ;;  %v173_v38 = vmul.f32 %v171_v35, %v171_v35 }
 0x1b6   :  { %v172_v39 = vsub.f32 %v161_v31, %v170_v37  ;;  %v175_v40 = vsel %vm62_vm0, %v173_v38, 0.0 }
 0x1b7   :  { %176 = vadd.xlane.f32.xlu1 %v175_v40 }
 0x1b8   :  { %v174_v41 = vmul.f32 %v172_v39, %v172_v39 }
 0x1ba   :  { %v178_v42 = vsel %vm62_vm0, %v174_v41, 0.0 }
 0x1bb   :  { %179 = vadd.xlane.f32.xlu1 %v178_v42 }
 0x244   :  { %v177_v43 = vpop.xlane.xlu1 %176 }
 0x245   :  { %v181_v44 = vmul.f32 0.03125, %v177_v43 }
 0x247   :  { %v183_v45 = vadd.f32 1e-07, %v181_v44 }
 0x248   :  { %v180_v46 = vpop.xlane.xlu1 %179 }
 0x249   :  { %266 = vrsqrt.f32 %v183_v45  ;;  %v182_v47 = vmul.f32 0.03125, %v180_v46 }
 0x24b   :  { %v184_v48 = vadd.f32 1e-07, %v182_v47 }
 0x24d   :  { %268 = vrsqrt.f32 %v184_v48 }
 0x253   :  { %v267_v49 = vpop.eup %266 }
 0x254   :  { %v187_v51 = vmul.f32 %v267_v49, %v171_v35 }
 0x256   :  { %v196_v53 = vmul.f32 %v230_v50, %v187_v51 }
 0x257   :  { %v269_v54 = vpop.eup %268 }
 0x258   :  { %v188_v55 = vmul.f32 %v269_v54, %v172_v39  ;;  %v205_v56 = vadd.f32 %v231_v52, %v196_v53 }
 0x25a   :  { %v197_v57 = vmul.f32 %v230_v50, %v188_v55  ;;  %207 = vst.msk [vmem:[#allocation7] sm:$0xff] %vm62_vm0, %v205_v56 }
 0x25c   :  { %v206_v58 = vadd.f32 %v231_v52, %v197_v57 }
 0x25e   :  { %208 = vst.msk [vmem:[#allocation7 + $0x8] sm:$0xff] %vm62_vm0, %v206_v58 }
 0x25f   :  { %325 = shalt.err (!%p322_p6)
}
 0x260   :  { %s326_s25 = scalar_lea.hbm %s444_s5, 256 }
 0x261   :  { %p327_p7 = scmp.ne.s32.totalorder %s444_s5, %s326_s25  ;;  %p330_p8 = scmp.lt.u32.totalorder %s326_s25, %s444_s5 }
 0x263   :  { %p332_p9 = pnand %p330_p8, %p327_p7 }
 0x265   :  { %335 = shalt.err (!%p332_p9)
}
 0x266   :  { %220 = dma.vmem_to_hbm [thread:$0]  %s215_s23, 256, %s444_s5, [#allocation4], %s343_s28, %s343_s28, %s344_s29  }
 0x267   :  { %340 = dma.done.wait [#allocation4], 256  }
 0x268   :  { %341 = vsyncadd [#allocation4], 4294967040 }
 0x269   :  { %224 = vsyncpa [#allocation3], 1 }
 0x26a   :  { %225 = vsyncpa [#allocation6], 1 }
 0x26b   :  { %226 = vsyncpa [#allocation4], 1 }

</bundles_post_ra>
